<compile_context>
chip_gen: v7x
topology: tpu7x:2x2x1
jax: 0.10.0
libtpu: 0.0.40
codegen_flags: <defaults>
</compile_context>

<pallas_src>
import functools

import jax
import jax.numpy as jnp
from jax.experimental import pallas as pl
from jax.experimental.pallas import tpu as pltpu


def _round_up(v, m):
    return (v + m - 1) // m * m


# --------------------------------------------------------------------------- #
# Fused kernel: conv1 (phase 0) then conv2 + pool + linear (phase 1).
# --------------------------------------------------------------------------- #
def _fused_gnn_kernel(a_ref, x_ref, pt_ref,
                      w1l_ref, w1r_ref, b1_ref,
                      w2l_ref, w2r_ref, b2_ref,
                      wlin_ref, blin_ref,
                      out_ref,
                      h1_ref, acc_ref,
                      *, tm, nb, a_resident):
    """Grid = (2, nb): phase-major iteration, node-row blocks of size tm.

    a_ref   : (n_pad, n_pad) bf16 resident  OR  (tm, n_pad) bf16 streamed
    x_ref   : (n_pad, c_in)  bf16 resident node features
    pt_ref  : (n_pad, g_pad) f32  resident transposed mean-pool operator
    w1l/w1r : (c_in, hid_pad)   bf16      b1 : (1, hid_pad) f32
    w2l/w2r : (hid_pad, hid_pad) bf16     b2 : (1, hid_pad) f32
    wlin    : (hid_pad, out_pad) f32      blin: (1, out_pad) f32
    out_ref : (g_pad, out_pad) f32  (resident across grid, written last step)
    h1_ref  : (n_pad, hid_pad) bf16 scratch (layer-1 activations)
    acc_ref : (g_pad, hid_pad) f32  scratch (pooled sums)
    """
    phase = pl.program_id(0)
    i = pl.program_id(1)
    row0 = pl.multiple_of(i * tm, tm)

    if a_resident:
        a_blk = a_ref[pl.ds(row0, tm), :]        # A DMA'd once, sliced in VMEM
    else:
        a_blk = a_ref[...]                       # streamed (tm, n_pad) row block

    @pl.when((phase == 0) & (i == 0))
    def _init():
        acc_ref[...] = jnp.zeros_like(acc_ref)

    @pl.when(phase == 0)
    def _conv1():
        # Mean-neighbor aggregation (bf16 MXU inputs, f32 accumulation).
        agg = jnp.dot(a_blk, x_ref[...], preferred_element_type=jnp.float32)
        x_blk = x_ref[pl.ds(row0, tm), :]
        h = (jnp.dot(agg.astype(jnp.bfloat16), w1l_ref[...],
                     preferred_element_type=jnp.float32)
             + jnp.dot(x_blk, w1r_ref[...],
                       preferred_element_type=jnp.float32)
             + b1_ref[...])
        # ReLU; Dropout(p=0.5) is identity in eval mode. Store directly in bf16.
        h1_ref[pl.ds(row0, tm), :] = jnp.maximum(h, 0.0).astype(h1_ref.dtype)

    @pl.when(phase == 1)
    def _conv2_pool():
        agg = jnp.dot(a_blk, h1_ref[...], preferred_element_type=jnp.float32)
        h1_blk = h1_ref[pl.ds(row0, tm), :]
        h2 = (jnp.dot(agg.astype(jnp.bfloat16), w2l_ref[...],
                      preferred_element_type=jnp.float32)
              + jnp.dot(h1_blk, w2r_ref[...],
                        preferred_element_type=jnp.float32)
              + b2_ref[...])
        h2 = jnp.maximum(h2, 0.0)                                 # (tm, hid_pad)
        pt_blk = pt_ref[pl.ds(row0, tm), :]                       # (tm, g_pad)
        acc_ref[...] += jax.lax.dot_general(
            pt_blk, h2,
            dimension_numbers=(((0,), (0,)), ((), ())),
            preferred_element_type=jnp.float32)                   # (g_pad, hid_pad)

    @pl.when((phase == 1) & (i == nb - 1))
    def _finalize():
        out_ref[...] = (jnp.dot(acc_ref[...], wlin_ref[...],
                                preferred_element_type=jnp.float32)
                        + blin_ref[...])


# --------------------------------------------------------------------------- #
# Wrapper: padding, operator construction, VMEM sizing, pallas_call.
# --------------------------------------------------------------------------- #
def _vmem_budgets():
    """(sizing_budget, vmem_limit_bytes) per TPU generation."""
    try:
        phys = int(getattr(pltpu.get_tpu_info(), "vmem_capacity_bytes",
                           64 * 1024 * 1024))
    except Exception:
        phys = 64 * 1024 * 1024
    sizing = int(phys * 0.70)                       # what our buffers may use
    limit = min(int(phys * 0.85), 100 * 1024 * 1024)  # compiler scoped limit
    return sizing, limit


def solidity_gnn_forward(x, edge_index, batch, params, num_graphs, *,
                         block_m=512, force_stream_a=False):
    n, c_in = x.shape
    w1l, w1r, b1, w2l, w2r, b2, wlin, blin = params
    hid = w1l.shape[1]
    out_ch = wlin.shape[1]

    hid_pad = _round_up(hid, 128)
    out_pad = _round_up(out_ch, 128)
    g_pad = _round_up(num_graphs, 8)

    sizing_budget, vmem_limit = _vmem_budgets()

    def resident_bytes(rows):
        return (rows * c_in * 2                 # X bf16
                + rows * g_pad * 4              # pool^T f32
                + rows * hid_pad * 2            # h1 scratch bf16
                + 2 * c_in * hid_pad * 2        # W1l, W1r bf16
                + 2 * hid_pad * hid_pad * 2     # W2l, W2r bf16
                + hid_pad * out_pad * 4         # Wlin f32
                + g_pad * hid_pad * 4           # pooled accumulator f32
                + g_pad * out_pad * 4           # output f32
                + 3 * hid_pad * 4 + out_pad * 4)

    # Row-block size: largest multiple of 16 (clean bf16 sublane packing) that
    # the VMEM budget allows, capped at block_m; node count padded to it.
    tm_cap = max(16, _round_up(min(block_m, max(n, 16)), 16))
    a_resident = False
    tm = tm_cap
    n_pad = _round_up(n, tm)
    if not force_stream_a:
        tm = min(tm_cap, _round_up(n, 16))
        n_pad = _round_up(n, tm)
        if 2 * n_pad * n_pad + resident_bytes(n_pad) <= sizing_budget:
            a_resident = True
    if not a_resident:
        n_guess = _round_up(n, 16) + tm_cap
        avail = max(sizing_budget - resident_bytes(n_guess), 0)
        tm_fit = (avail // (4 * n_guess)) // 16 * 16   # 2 buffers x bf16 tiles
        tm = max(16, min(tm_cap, max(tm_fit, 16), _round_up(n, 16)))
        n_pad = _round_up(n, tm)
        # TODO(synk): switch to an edge-list / segment-sum kernel when even a
        #             16-row streamed A tile would exceed the VMEM budget.
    nb = n_pad // tm

    # Dense mean-aggregation operator A[i, j] = (#edges j->i) / indeg(i).
    # Padded rows/cols are exactly zero.
    src = edge_index[0].astype(jnp.int32)
    dst = edge_index[1].astype(jnp.int32)
    adj = jnp.zeros((n_pad, n_pad), jnp.float32).at[dst, src].add(1.0)
    deg = jnp.maximum(jnp.sum(adj, axis=1, keepdims=True), 1.0)
    a_bf16 = (adj / deg).astype(jnp.bfloat16)

    # Transposed mean-pool operator Pt[i, g] = 1/|graph g| if batch[i] == g.
    onehot = (batch[:, None] == jnp.arange(num_graphs)[None, :]).astype(jnp.float32)
    pool_t_core = onehot / jnp.maximum(jnp.sum(onehot, axis=0, keepdims=True), 1.0)
    pool_t = jnp.zeros((n_pad, g_pad), jnp.float32).at[:n, :num_graphs].set(pool_t_core)

    # bf16 copies / zero-padded parameters, all hoisted out of the kernel.
    x_bf16 = jnp.zeros((n_pad, c_in), jnp.bfloat16).at[:n, :].set(
        x.astype(jnp.bfloat16))

    def _pad2d(a, shape, dtype):
        return jnp.zeros(shape, dtype).at[:a.shape[0], :a.shape[1]].set(
            a.astype(dtype))

    w1l_p = _pad2d(w1l, (c_in, hid_pad), jnp.bfloat16)
    w1r_p = _pad2d(w1r, (c_in, hid_pad), jnp.bfloat16)
    b1_p = _pad2d(b1, (1, hid_pad), jnp.float32)
    w2l_p = _pad2d(w2l, (hid_pad, hid_pad), jnp.bfloat16)
    w2r_p = _pad2d(w2r, (hid_pad, hid_pad), jnp.bfloat16)
    b2_p = _pad2d(b2, (1, hid_pad), jnp.float32)
    wlin_p = _pad2d(wlin, (hid_pad, out_pad), jnp.float32)
    blin_p = _pad2d(blin, (1, out_pad), jnp.float32)

    def res_spec(shape):
        return pl.BlockSpec(shape, lambda p, i: (0, 0))

    if a_resident:
        a_spec = res_spec((n_pad, n_pad))                 # DMA'd from HBM once
    else:
        a_spec = pl.BlockSpec((tm, n_pad), lambda p, i: (i, 0))  # streamed

    kernel = functools.partial(_fused_gnn_kernel, tm=tm, nb=nb,
                               a_resident=a_resident)

    a_passes = 1 if a_resident else 2
    flops = (2 * n_pad * n_pad * (c_in + hid_pad)
             + 4 * n_pad * hid_pad * (c_in + hid_pad)
             + 2 * n_pad * g_pad * hid_pad
             + 2 * g_pad * hid_pad * out_pad)
    bytes_accessed = int(a_passes * a_bf16.size * 2 + x_bf16.size * 2
                         + pool_t.size * 4
                         + (w1l_p.size + w1r_p.size + w2l_p.size + w2r_p.size) * 2
                         + wlin_p.size * 4 + g_pad * out_pad * 4)

    out_padded = pl.pallas_call(
        kernel,
        out_shape=jax.ShapeDtypeStruct((g_pad, out_pad), jnp.float32),
        grid=(2, nb),
        in_specs=[a_spec,
                  res_spec((n_pad, c_in)),
                  res_spec((n_pad, g_pad)),
                  res_spec((c_in, hid_pad)),
                  res_spec((c_in, hid_pad)),
                  res_spec((1, hid_pad)),
                  res_spec((hid_pad, hid_pad)),
                  res_spec((hid_pad, hid_pad)),
                  res_spec((1, hid_pad)),
                  res_spec((hid_pad, out_pad)),
                  res_spec((1, out_pad))],
        out_specs=pl.BlockSpec((g_pad, out_pad), lambda p, i: (0, 0)),
        scratch_shapes=[pltpu.VMEM((n_pad, hid_pad), jnp.bfloat16),   # h1
                        pltpu.VMEM((g_pad, hid_pad), jnp.float32)],   # pooled
        compiler_params=pltpu.CompilerParams(
            dimension_semantics=("arbitrary", "arbitrary"),
            vmem_limit_bytes=vmem_limit),
        cost_estimate=pl.CostEstimate(flops=flops, transcendentals=0,
                                      bytes_accessed=bytes_accessed),
    )(a_bf16, x_bf16, pool_t, w1l_p, w1r_p, b1_p, w2l_p, w2r_p, b2_p,
      wlin_p, blin_p)

    return out_padded[:num_graphs, :out_ch]


# --------------------------------------------------------------------------- #
# Pure-JAX f32 reference (mirrors the PyTorch forward in eval mode).
# --------------------------------------------------------------------------- #
def _reference_forward(x, edge_index, batch, params, num_graphs):
    n = x.shape[0]
    src, dst = edge_index[0], edge_index[1]
    adj = jnp.zeros((n, n), jnp.float32).at[dst, src].add(1.0)
    agg = adj / jnp.maximum(jnp.sum(adj, axis=1, keepdims=True), 1.0)
    onehot = (batch[None, :] == jnp.arange(num_graphs)[:, None]).astype(jnp.float32)
    pool = onehot / jnp.maximum(jnp.sum(onehot, axis=1, keepdims=True), 1.0)

    w1l, w1r, b1, w2l, w2r, b2, wlin, blin = params
    h1 = jnp.maximum((agg @ x) @ w1l + x @ w1r + b1, 0.0)
    h2 = jnp.maximum((agg @ h1) @ w2l + h1 @ w2r + b2, 0.0)
    return (pool @ h2) @ wlin + blin


if __name__ == "__main__":
    # Small shapes consistent with the module (2 graphs of 16 nodes each).
    N = 32            # nodes
    E = 80            # edges
    C_IN = 8          # in_channels
    HID = 32          # hidden_channels
    C_OUT = 4         # out_channels
    G = 2             # graphs in the batch

    key = jax.random.PRNGKey(0)
    k_x, k_e1, k_e2, k_w1l, k_w1r, k_w2l, k_w2r, k_wl = jax.random.split(key, 8)

    x = jax.random.normal(k_x, (N, C_IN), jnp.float32)
    edge_index = jnp.stack([
        jax.random.randint(k_e1, (E,), 0, N),
        jax.random.randint(k_e2, (E,), 0, N),
    ]).astype(jnp.int32)                                   # [2, E]
    batch = jnp.concatenate([jnp.zeros((N // 2,), jnp.int32),
                             jnp.ones((N - N // 2,), jnp.int32)])

    def init_w(k, fan_in, fan_out):
        return 0.1 * jax.random.normal(k, (fan_in, fan_out), jnp.float32)

    params = (
        init_w(k_w1l, C_IN, HID),                 # conv1.lin_l.weight^T (aggregated)
        init_w(k_w1r, C_IN, HID),                 # conv1.lin_r.weight^T (root)
        jnp.zeros((1, HID), jnp.float32),         # conv1 bias
        init_w(k_w2l, HID, HID),                  # conv2.lin_l.weight^T
        init_w(k_w2r, HID, HID),                  # conv2.lin_r.weight^T
        jnp.full((1, HID), 0.01, jnp.float32),    # conv2 bias
        init_w(k_wl, HID, C_OUT),                 # linear.weight^T
        jnp.full((1, C_OUT), 0.02, jnp.float32),  # linear.bias
    )

    ref = _reference_forward(x, edge_index, batch, params, G)

    # Path 1: default config -> A resident in VMEM, single row block per phase.
    out_resident = jax.block_until_ready(
        solidity_gnn_forward(x, edge_index, batch, params, G))
    # Path 2: forced streamed A with a small row block -> exercises the
    # multi-block grid, dynamic slicing and the pooled accumulator.
    out_streamed = jax.block_until_ready(
        solidity_gnn_forward(x, edge_index, batch, params, G,
                             block_m=16, force_stream_a=True))

    assert out_resident.shape == (G, C_OUT)
    assert out_streamed.shape == (G, C_OUT)
    # bf16 MXU inputs with f32 accumulation -> loosened tolerance vs f32 ref.
    assert jnp.allclose(out_resident, ref, atol=2e-2, rtol=2e-2), (out_resident, ref)
    assert jnp.allclose(out_streamed, ref, atol=2e-2, rtol=2e-2), (out_streamed, ref)

    print("KERNEL_OK")
</pallas_src>

<mosaic_0001>
module attributes {stable_mosaic.version = 11 : i64} {
  func.func @_fused_gnn_kernel(%arg0: i32, %arg1: i32, %arg2: memref<32x32xbf16, #tpu.memory_space<vmem>>, %arg3: memref<32x8xbf16, #tpu.memory_space<vmem>>, %arg4: memref<32x8xf32, #tpu.memory_space<vmem>>, %arg5: memref<8x128xbf16, #tpu.memory_space<vmem>>, %arg6: memref<8x128xbf16, #tpu.memory_space<vmem>>, %arg7: memref<1x128xf32, #tpu.memory_space<vmem>>, %arg8: memref<128x128xbf16, #tpu.memory_space<vmem>>, %arg9: memref<128x128xbf16, #tpu.memory_space<vmem>>, %arg10: memref<1x128xf32, #tpu.memory_space<vmem>>, %arg11: memref<128x128xf32, #tpu.memory_space<vmem>>, %arg12: memref<1x128xf32, #tpu.memory_space<vmem>>, %arg13: memref<8x128xf32, #tpu.memory_space<vmem>>, %arg14: memref<32x128xbf16, #tpu.memory_space<vmem>>, %arg15: memref<8x128xf32, #tpu.memory_space<vmem>>) attributes {dimension_semantics = [#tpu.dimension_semantics<arbitrary>, #tpu.dimension_semantics<arbitrary>], iteration_bounds = array<i64: 2, 1>, scalar_prefetch = 0 : i64, scratch_operands = 2 : i64, tpu.core_type = #tpu.core_type<tc>, window_params = [{pipeline_mode = #tpu.pipeline_mode<synchronous>, transform_indices = @transform_0, window_bounds = array<i64: 32, 32>}, {pipeline_mode = #tpu.pipeline_mode<synchronous>, transform_indices = @transform_1, window_bounds = array<i64: 32, 8>}, {pipeline_mode = #tpu.pipeline_mode<synchronous>, transform_indices = @transform_2, window_bounds = array<i64: 32, 8>}, {pipeline_mode = #tpu.pipeline_mode<synchronous>, transform_indices = @transform_3, window_bounds = array<i64: 8, 128>}, {pipeline_mode = #tpu.pipeline_mode<synchronous>, transform_indices = @transform_4, window_bounds = array<i64: 8, 128>}, {pipeline_mode = #tpu.pipeline_mode<synchronous>, transform_indices = @transform_5, window_bounds = array<i64: 1, 128>}, {pipeline_mode = #tpu.pipeline_mode<synchronous>, transform_indices = @transform_6, window_bounds = array<i64: 128, 128>}, {pipeline_mode = #tpu.pipeline_mode<synchronous>, transform_indices = @transform_7, window_bounds = array<i64: 128, 128>}, {pipeline_mode = #tpu.pipeline_mode<synchronous>, transform_indices = @transform_8, window_bounds = array<i64: 1, 128>}, {pipeline_mode = #tpu.pipeline_mode<synchronous>, transform_indices = @transform_9, window_bounds = array<i64: 128, 128>}, {pipeline_mode = #tpu.pipeline_mode<synchronous>, transform_indices = @transform_10, window_bounds = array<i64: 1, 128>}, {pipeline_mode = #tpu.pipeline_mode<synchronous>, transform_indices = @transform_11, window_bounds = array<i64: 8, 128>}]} {
    %c32_i32 = arith.constant 32 : i32
    %0 = arith.muli %arg1, %c32_i32 : i32
    %1 = tpu.assume_multiple %0, 32 : i32
    %2 = arith.index_cast %1 : i32 to index
    %c0 = arith.constant 0 : index
    %3 = vector.load %arg2[%2, %c0] : memref<32x32xbf16, #tpu.memory_space<vmem>>, vector<32x32xbf16>
    %c0_i32 = arith.constant 0 : i32
    %4 = arith.cmpi eq, %arg0, %c0_i32 : i32
    %c0_i32_0 = arith.constant 0 : i32
    %5 = arith.cmpi eq, %arg1, %c0_i32_0 : i32
    %6 = arith.andi %4, %5 : i1
    %7 = arith.extui %6 : i1 to i32
    %c0_i32_1 = arith.constant 0 : i32
    %8 = arith.cmpi ne, %7, %c0_i32_1 : i32
    scf.if %8 {
      %cst = arith.constant 0.000000e+00 : f32
      %20 = vector.broadcast %cst : f32 to vector<8x128xf32>
      %c0_8 = arith.constant 0 : index
      %c0_9 = arith.constant 0 : index
      %21 = vector.load %arg15[%c0_8, %c0_9] : memref<8x128xf32, #tpu.memory_space<vmem>>, vector<8x128xf32>
      tpu.vector_store %arg15[%c0_8, %c0_9], %20 {strides = array<i32>} : memref<8x128xf32, #tpu.memory_space<vmem>>, vector<8x128xf32>,
    } else {
    }
    %c0_i32_2 = arith.constant 0 : i32
    %9 = arith.cmpi eq, %arg0, %c0_i32_2 : i32
    %10 = arith.extui %9 : i1 to i32
    %c0_i32_3 = arith.constant 0 : i32
    %11 = arith.cmpi ne, %10, %c0_i32_3 : i32
    scf.if %11 {
      %c0_8 = arith.constant 0 : index
      %c0_9 = arith.constant 0 : index
      %20 = vector.load %arg3[%c0_8, %c0_9] : memref<32x8xbf16, #tpu.memory_space<vmem>>, vector<32x8xbf16>
      %cst = arith.constant dense<0.000000e+00> : vector<32x8xf32>
      %21 = tpu.matmul %3, %20, %cst {dimension_numbers = #tpu.dot_dimension_numbers<[1], [0], [0], [1], [0, 0, 1, 1], [], []>} : vector<32x32xbf16>, vector<32x8xbf16>, vector<32x8xf32> -> vector<32x8xf32>
      %22 = arith.index_cast %1 : i32 to index
      %c0_10 = arith.constant 0 : index
      %23 = vector.load %arg3[%22, %c0_10] : memref<32x8xbf16, #tpu.memory_space<vmem>>, vector<32x8xbf16>
      %24 = arith.truncf %21 : vector<32x8xf32> to vector<32x8xbf16>
      %c0_11 = arith.constant 0 : index
      %c0_12 = arith.constant 0 : index
      %25 = vector.load %arg5[%c0_11, %c0_12] : memref<8x128xbf16, #tpu.memory_space<vmem>>, vector<8x128xbf16>
      %cst_13 = arith.constant dense<0.000000e+00> : vector<32x128xf32>
      %26 = tpu.matmul %24, %25, %cst_13 {dimension_numbers = #tpu.dot_dimension_numbers<[1], [0], [0], [1], [0, 0, 1, 1], [], []>} : vector<32x8xbf16>, vector<8x128xbf16>, vector<32x128xf32> -> vector<32x128xf32>
      %c0_14 = arith.constant 0 : index
      %c0_15 = arith.constant 0 : index
      %27 = vector.load %arg6[%c0_14, %c0_15] : memref<8x128xbf16, #tpu.memory_space<vmem>>, vector<8x128xbf16>
      %cst_16 = arith.constant dense<0.000000e+00> : vector<32x128xf32>
      %28 = tpu.matmul %23, %27, %cst_16 {dimension_numbers = #tpu.dot_dimension_numbers<[1], [0], [0], [1], [0, 0, 1, 1], [], []>} : vector<32x8xbf16>, vector<8x128xbf16>, vector<32x128xf32> -> vector<32x128xf32>
      %29 = arith.addf %26, %28 : vector<32x128xf32>
      %c0_17 = arith.constant 0 : index
      %c0_18 = arith.constant 0 : index
      %30 = vector.load %arg7[%c0_17, %c0_18] : memref<1x128xf32, #tpu.memory_space<vmem>>, vector<1x128xf32>
      %31 = vector.broadcast %30 : vector<1x128xf32> to vector<32x128xf32>
      %32 = arith.addf %29, %31 : vector<32x128xf32>
      %cst_19 = arith.constant 0.000000e+00 : f32
      %33 = vector.broadcast %cst_19 : f32 to vector<32x128xf32>
      %34 = arith.maximumf %32, %33 : vector<32x128xf32>
      %35 = arith.truncf %34 : vector<32x128xf32> to vector<32x128xbf16>
      %36 = arith.index_cast %1 : i32 to index
      %c0_20 = arith.constant 0 : index
      %37 = vector.load %arg14[%36, %c0_20] : memref<32x128xbf16, #tpu.memory_space<vmem>>, vector<32x128xbf16>
      tpu.vector_store %arg14[%36, %c0_20], %35 {strides = array<i32>} : memref<32x128xbf16, #tpu.memory_space<vmem>>, vector<32x128xbf16>,
    } else {
    }
    %c1_i32 = arith.constant 1 : i32
    %12 = arith.cmpi eq, %arg0, %c1_i32 : i32
    %13 = arith.extui %12 : i1 to i32
    %c0_i32_4 = arith.constant 0 : i32
    %14 = arith.cmpi ne, %13, %c0_i32_4 : i32
    scf.if %14 {
      %c0_8 = arith.constant 0 : index
      %c0_9 = arith.constant 0 : index
      %20 = vector.load %arg14[%c0_8, %c0_9] : memref<32x128xbf16, #tpu.memory_space<vmem>>, vector<32x128xbf16>
      %cst = arith.constant dense<0.000000e+00> : vector<32x128xf32>
      %21 = tpu.matmul %3, %20, %cst {dimension_numbers = #tpu.dot_dimension_numbers<[1], [0], [0], [1], [0, 0, 1, 1], [], []>} : vector<32x32xbf16>, vector<32x128xbf16>, vector<32x128xf32> -> vector<32x128xf32>
      %22 = arith.index_cast %1 : i32 to index
      %c0_10 = arith.constant 0 : index
      %23 = vector.load %arg14[%22, %c0_10] : memref<32x128xbf16, #tpu.memory_space<vmem>>, vector<32x128xbf16>
      %24 = arith.truncf %21 : vector<32x128xf32> to vector<32x128xbf16>
      %c0_11 = arith.constant 0 : index
      %c0_12 = arith.constant 0 : index
      %25 = vector.load %arg8[%c0_11, %c0_12] : memref<128x128xbf16, #tpu.memory_space<vmem>>, vector<128x128xbf16>
      %cst_13 = arith.constant dense<0.000000e+00> : vector<32x128xf32>
      %26 = tpu.matmul %24, %25, %cst_13 {dimension_numbers = #tpu.dot_dimension_numbers<[1], [0], [0], [1], [0, 0, 1, 1], [], []>} : vector<32x128xbf16>, vector<128x128xbf16>, vector<32x128xf32> -> vector<32x128xf32>
      %c0_14 = arith.constant 0 : index
      %c0_15 = arith.constant 0 : index
      %27 = vector.load %arg9[%c0_14, %c0_15] : memref<128x128xbf16, #tpu.memory_space<vmem>>, vector<128x128xbf16>
      %cst_16 = arith.constant dense<0.000000e+00> : vector<32x128xf32>
      %28 = tpu.matmul %23, %27, %cst_16 {dimension_numbers = #tpu.dot_dimension_numbers<[1], [0], [0], [1], [0, 0, 1, 1], [], []>} : vector<32x128xbf16>, vector<128x128xbf16>, vector<32x128xf32> -> vector<32x128xf32>
      %29 = arith.addf %26, %28 : vector<32x128xf32>
      %c0_17 = arith.constant 0 : index
      %c0_18 = arith.constant 0 : index
      %30 = vector.load %arg10[%c0_17, %c0_18] : memref<1x128xf32, #tpu.memory_space<vmem>>, vector<1x128xf32>
      %31 = vector.broadcast %30 : vector<1x128xf32> to vector<32x128xf32>
      %32 = arith.addf %29, %31 : vector<32x128xf32>
      %cst_19 = arith.constant 0.000000e+00 : f32
      %33 = vector.broadcast %cst_19 : f32 to vector<32x128xf32>
      %34 = arith.maximumf %32, %33 : vector<32x128xf32>
      %35 = arith.index_cast %1 : i32 to index
      %c0_20 = arith.constant 0 : index
      %36 = vector.load %arg4[%35, %c0_20] : memref<32x8xf32, #tpu.memory_space<vmem>>, vector<32x8xf32>
      %c0_21 = arith.constant 0 : index
      %c0_22 = arith.constant 0 : index
      %37 = vector.load %arg15[%c0_21, %c0_22] : memref<8x128xf32, #tpu.memory_space<vmem>>, vector<8x128xf32>
      %cst_23 = arith.constant dense<0.000000e+00> : vector<8x128xf32>
      %38 = tpu.matmul %36, %34, %cst_23 {dimension_numbers = #tpu.dot_dimension_numbers<[0], [0], [1], [1], [0, 1, 1, 1], [], []>} : vector<32x8xf32>, vector<32x128xf32>, vector<8x128xf32> -> vector<8x128xf32>
      %39 = arith.addf %37, %38 : vector<8x128xf32>
      %c0_24 = arith.constant 0 : index
      %c0_25 = arith.constant 0 : index
      %40 = vector.load %arg15[%c0_24, %c0_25] : memref<8x128xf32, #tpu.memory_space<vmem>>, vector<8x128xf32>
      tpu.vector_store %arg15[%c0_24, %c0_25], %39 {strides = array<i32>} : memref<8x128xf32, #tpu.memory_space<vmem>>, vector<8x128xf32>,
    } else {
    }
    %c1_i32_5 = arith.constant 1 : i32
    %15 = arith.cmpi eq, %arg0, %c1_i32_5 : i32
    %c0_i32_6 = arith.constant 0 : i32
    %16 = arith.cmpi eq, %arg1, %c0_i32_6 : i32
    %17 = arith.andi %15, %16 : i1
    %18 = arith.extui %17 : i1 to i32
    %c0_i32_7 = arith.constant 0 : i32
    %19 = arith.cmpi ne, %18, %c0_i32_7 : i32
    scf.if %19 {
      %c0_8 = arith.constant 0 : index
      %c0_9 = arith.constant 0 : index
      %20 = vector.load %arg15[%c0_8, %c0_9] : memref<8x128xf32, #tpu.memory_space<vmem>>, vector<8x128xf32>
      %c0_10 = arith.constant 0 : index
      %c0_11 = arith.constant 0 : index
      %21 = vector.load %arg11[%c0_10, %c0_11] : memref<128x128xf32, #tpu.memory_space<vmem>>, vector<128x128xf32>
      %cst = arith.constant dense<0.000000e+00> : vector<8x128xf32>
      %22 = tpu.matmul %20, %21, %cst {dimension_numbers = #tpu.dot_dimension_numbers<[1], [0], [0], [1], [0, 0, 1, 1], [], []>} : vector<8x128xf32>, vector<128x128xf32>, vector<8x128xf32> -> vector<8x128xf32>
      %c0_12 = arith.constant 0 : index
      %c0_13 = arith.constant 0 : index
      %23 = vector.load %arg12[%c0_12, %c0_13] : memref<1x128xf32, #tpu.memory_space<vmem>>, vector<1x128xf32>
      %24 = vector.broadcast %23 : vector<1x128xf32> to vector<8x128xf32>
      %25 = arith.addf %22, %24 : vector<8x128xf32>
      %c0_14 = arith.constant 0 : index
      %c0_15 = arith.constant 0 : index
      %26 = vector.load %arg13[%c0_14, %c0_15] : memref<8x128xf32, #tpu.memory_space<vmem>>, vector<8x128xf32>
      tpu.vector_store %arg13[%c0_14, %c0_15], %25 {strides = array<i32>} : memref<8x128xf32, #tpu.memory_space<vmem>>, vector<8x128xf32>,
    } else {
    }
    return
  }
  func.func @transform_0(%arg0: i32, %arg1: i32) -> (i32, i32) {
    %c0_i32 = arith.constant 0 : i32
    %c0_i32_0 = arith.constant 0 : i32
    %c0_i32_1 = arith.constant 0 : i32
    return %c0_i32, %c0_i32_0 : i32, i32
  }
  func.func @transform_1(%arg0: i32, %arg1: i32) -> (i32, i32) {
    %c0_i32 = arith.constant 0 : i32
    %c0_i32_0 = arith.constant 0 : i32
    %c0_i32_1 = arith.constant 0 : i32
    return %c0_i32, %c0_i32_0 : i32, i32
  }
  func.func @transform_2(%arg0: i32, %arg1: i32) -> (i32, i32) {
    %c0_i32 = arith.constant 0 : i32
    %c0_i32_0 = arith.constant 0 : i32
    %c0_i32_1 = arith.constant 0 : i32
    return %c0_i32, %c0_i32_0 : i32, i32
  }
  func.func @transform_3(%arg0: i32, %arg1: i32) -> (i32, i32) {
    %c0_i32 = arith.constant 0 : i32
    %c0_i32_0 = arith.constant 0 : i32
    %c0_i32_1 = arith.constant 0 : i32
    return %c0_i32, %c0_i32_0 : i32, i32
  }
  func.func @transform_4(%arg0: i32, %arg1: i32) -> (i32, i32) {
    %c0_i32 = arith.constant 0 : i32
    %c0_i32_0 = arith.constant 0 : i32
    %c0_i32_1 = arith.constant 0 : i32
    return %c0_i32, %c0_i32_0 : i32, i32
  }
  func.func @transform_5(%arg0: i32, %arg1: i32) -> (i32, i32) {
    %c0_i32 = arith.constant 0 : i32
    %c0_i32_0 = arith.constant 0 : i32
    %c0_i32_1 = arith.constant 0 : i32
    return %c0_i32, %c0_i32_0 : i32, i32
  }
  func.func @transform_6(%arg0: i32, %arg1: i32) -> (i32, i32) {
    %c0_i32 = arith.constant 0 : i32
    %c0_i32_0 = arith.constant 0 : i32
    %c0_i32_1 = arith.constant 0 : i32
    return %c0_i32, %c0_i32_0 : i32, i32
  }
  func.func @transform_7(%arg0: i32, %arg1: i32) -> (i32, i32) {
    %c0_i32 = arith.constant 0 : i32
    %c0_i32_0 = arith.constant 0 : i32
    %c0_i32_1 = arith.constant 0 : i32
    return %c0_i32, %c0_i32_0 : i32, i32
  }
  func.func @transform_8(%arg0: i32, %arg1: i32) -> (i32, i32) {
    %c0_i32 = arith.constant 0 : i32
    %c0_i32_0 = arith.constant 0 : i32
    %c0_i32_1 = arith.constant 0 : i32
    return %c0_i32, %c0_i32_0 : i32, i32
  }
  func.func @transform_9(%arg0: i32, %arg1: i32) -> (i32, i32) {
    %c0_i32 = arith.constant 0 : i32
    %c0_i32_0 = arith.constant 0 : i32
    %c0_i32_1 = arith.constant 0 : i32
    return %c0_i32, %c0_i32_0 : i32, i32
  }
  func.func @transform_10(%arg0: i32, %arg1: i32) -> (i32, i32) {
    %c0_i32 = arith.constant 0 : i32
    %c0_i32_0 = arith.constant 0 : i32
    %c0_i32_1 = arith.constant 0 : i32
    return %c0_i32, %c0_i32_0 : i32, i32
  }
  func.func @transform_11(%arg0: i32, %arg1: i32) -> (i32, i32) {
    %c0_i32 = arith.constant 0 : i32
    %c0_i32_0 = arith.constant 0 : i32
    %c0_i32_1 = arith.constant 0 : i32
    return %c0_i32, %c0_i32_0 : i32, i32
  }
}

</mosaic_0001>

<bundles_post_ra>
// kernel: tpu_custom_call.1
= control target key start
LH: loop header
LB: loop body
LE: loop exit
PB: predicated region body
PF: predicated region fallthrough
CT: control target
= control target key end

     0   :  { %s2215_s0 = inlined_call_operand.vmem [shape: bf16[32,32], index: 0, kind: input, shape index: {}]   ;;  %s2216_s1 = inlined_call_operand.vmem [shape: bf16[32,8], index: 1, kind: input, shape index: {}]   ;;  %s2217_s2 = inlined_call_operand.vmem [shape: f32[32,8], index: 2, kind: input, shape index: {}]   ;;  %s2218_s3 = inlined_call_operand.hbm [shape: bf16[8,128], index: 3, kind: input, shape index: {}]   ;;  %s2219_s4 = inlined_call_operand.hbm [shape: bf16[8,128], index: 4, kind: input, shape index: {}]   ;;  %s2220_s5 = inlined_call_operand.vmem [shape: f32[1,128], index: 5, kind: input, shape index: {}]   ;;  %s2221_s6 = inlined_call_operand.vmem [shape: bf16[128,128], index: 6, kind: input, shape index: {}]   ;;  %s2222_s7 = inlined_call_operand.hbm [shape: bf16[128,128], index: 7, kind: input, shape index: {}]   ;;  %s2223_s8 = inlined_call_operand.vmem [shape: f32[1,128], index: 8, kind: input, shape index: {}]   ;;  %s2224_s9 = inlined_call_operand.hbm [shape: f32[128,128], index: 9, kind: input, shape index: {}]   ;;  %s2225_s10 = inlined_call_operand.vmem [shape: f32[1,128], index: 10, kind: input, shape index: {}]   ;;  %s2226_s11 = inlined_call_operand.hbm [shape: f32[8,128], index: 11, kind: output, shape index: {}]  }
   0x1   :  { %2232 = sst [smem:[#allocation18_spill]] %s2218_s3 }
   0x2   :  { %2233 = sst [smem:[#allocation19_spill]] %s2219_s4 }
   0x3   :  { %16 = vsyncpa [#allocation5], 0 }
   0x4   :  { %17 = vsyncpa [#allocation8], 0 }
   0x5   :  { %18 = vsyncpa [#allocation11], 0 }
   0x6   :  { %19 = vsyncpa [#allocation6], 0  ;;  %s1934_s17 = smov 0   ;;  %s1936_s18 = smov 0  }
   0x7   :  { %s1938_s19 = smov 0  }
   0x8 LB: > { %2234 = sst [smem:[#allocation17_spill]] %s1852_s18  ;;  %s1858_s20 = smov [#allocation7]   ;;  %s1856_s19 = sphi %s1938_s19, %s25_s19   ;;  %s1852_s18 = sphi %s1936_s18, %s2248_s18   ;;  %s1848_s17 = sphi %s1934_s17, %s2247_s17  }
   0x9   : > { %s327_s21 = sshll.u32 %s1858_s20, 4  ;;  %s2230_s22 = sadd.s32 4294967295, %s1856_s19   ;;  %s328_s21 = int_to_ptr.vmem [resolvable:$true] %s327_s21 }
   0xa   : > { %p1311_p0 = scmp.ge.s32.totalorder %s1856_s19, 1  ;;  %p294_p1 = scmp.lt.s32.totalorder %s1856_s19, 3 }
   0xb   : > { %p1954_p2 = scmp.eq.s32.totalorder %s2230_s22, 0  ;;  %s37_s25 = sadd.s32 1, %s1852_s18 }
   0xc   : > { %p1958_p3 = pnand %p1311_p0, %p294_p1  ;;  %p1971_p6 = scmp.ge.s32.totalorder %s37_s25, 2 }
   0xd   : > { %s2235_s23 = scalar_select %p1954_p2, 1, 0 }
   0xe   : > { %s2236_s24 = scalar_select %p1958_p3, 1, 0 }
   0xf   : > { %p1597_p4 = pneg %p1958_p3  ;;  %s1859_s28 = smov [#allocation4]  }
  0x10   : > { %s2238_s27 = scalar_select %p1971_p6, 1, 0 }
  0x11   : > { %p1967_p5 = pnand %p1954_p2, %p1597_p4  ;;  %s316_s29 = sshll.u32 %s1859_s28, 4  ;;  %s1975_s29 = int_to_ptr.vmem [resolvable:$true] %s316_s29 }
  0x12   : > { %s2239_s4 = sld [smem:[#allocation19_spill]] }
  0x13   : > { %p1985_p8 = pneg %p1967_p5 }
  0x18   : > { %s1680_s13 = scalar_lea.hbm %s2239_s4, 64 }
  0x19   : > { %p1681_p7 = scmp.ne.s32.totalorder %s2239_s4, %s1680_s13  ;;  %p1687_p11 = scmp.lt.u32.totalorder %s1680_s13, %s2239_s4 }
  0x1b   : > { %p1683_p9 = pnand %p1985_p8, %p1681_p7 }
  0x1d   : > { %p1684_p10 = pneg %p1683_p9 }
  0x1f   : > { %p1689_p12 = pnand %p1687_p11, %p1684_p10 }
  0x21   : > { %1692 = shalt.err (!%p1689_p12)
}
  0x22   : > { %s1693_s30 = scalar_lea.vmem %s328_s21, 64  ;;  %p1701_p4 = scmp.lt.s32.totalorder %s328_s21, %s328_s21 }
  0x23   : > { %p1694_p13 = scmp.ne.s32.totalorder %s328_s21, %s1693_s30  ;;  %p1702_p2 = scmp.lt.s32.totalorder %s1693_s30, %s1693_s30 }
  0x25   : > { %p1696_p0 = pnand %p1694_p13, %p1985_p8  ;;  %p1703_p3 = por %p1702_p2, %p1701_p4 }
  0x27   : > { %p1697_p1 = pneg %p1696_p0 }
  0x29   : > { %p1704_p6 = pnand %p1703_p3, %p1697_p1 }
  0x2b   : > { %1707 = shalt.err (!%p1704_p6)
}
  0x2c   : > { %1603 = dma.hbm_to_vmem [thread:$0]  (!%p1967_p5), %s2239_s4, 64, %s328_s21, [#allocation8]  }
  0x2d   : > { %p2241_p7 = scmp.ne.s32.totalorder %s2238_s27, 0  ;;  %s2242_s3 = sld [smem:[#allocation18_spill]] }
  0x2f   : > { %s2250_s25 = smov (%p2241_p7, %s37_s25), 0 }
  0x33   : > { %s1708_s20 = scalar_lea.hbm %s2242_s3, 64 }
  0x34   : > { %p1709_p2 = scmp.ne.s32.totalorder %s2242_s3, %s1708_s20  ;;  %p1715_p9 = scmp.lt.u32.totalorder %s1708_s20, %s2242_s3 }
  0x36   : > { %p1711_p3 = pnand %p1709_p2, %p1985_p8 }
  0x38   : > { %p1712_p6 = pneg %p1711_p3 }
  0x3a   : > { %p1717_p10 = pnand %p1715_p9, %p1712_p6 }
  0x3c   : > { %1720 = shalt.err (!%p1717_p10)
}
  0x3d   : > { %s1721_s21 = scalar_lea.vmem %s1975_s29, 64  ;;  %p1729_p0 = scmp.lt.s32.totalorder %s1975_s29, %s1975_s29 }
  0x3e   : > { %p1722_p11 = scmp.ne.s32.totalorder %s1975_s29, %s1721_s21  ;;  %p1730_p1 = scmp.lt.s32.totalorder %s1721_s21, %s1721_s21 }
  0x40   : > { %p1724_p12 = pnand %p1722_p11, %p1985_p8  ;;  %p1731_p4 = por %p1730_p1, %p1729_p0 }
  0x42   : > { %p1725_p13 = pneg %p1724_p12 }
  0x44   : > { %p1732_p7 = pnand %p1731_p4, %p1725_p13 }
  0x46   : > { %1735 = shalt.err (!%p1732_p7)
}
  0x47   : > { %1600 = dma.hbm_to_vmem [thread:$0]  (!%p1967_p5), %s2242_s3, 64, %s1975_s29, [#allocation5]  }
  0x48   : > { %s1860_s27 = smov [#allocation9]   ;;  %s1736_s15 = scalar_lea.hbm %s2222_s7, 1024 }
  0x49   : > { %s343_s12 = sshll.u32 %s1860_s27, 4  ;;  %p1737_p2 = scmp.ne.s32.totalorder %s2222_s7, %s1736_s15  ;;  %s344_s12 = int_to_ptr.vmem [resolvable:$true] %s343_s12 }
  0x4a   : > { %p1743_p9 = scmp.lt.u32.totalorder %s1736_s15, %s2222_s7 }
  0x4b   : > { %p1739_p3 = pnand %p1737_p2, %p1985_p8 }
  0x4d   : > { %p1740_p6 = pneg %p1739_p3 }
  0x4f   : > { %p1745_p10 = pnand %p1743_p9, %p1740_p6 }
  0x51   : > { %1748 = shalt.err (!%p1745_p10)
}
  0x52   : > { %s1749_s29 = scalar_lea.vmem %s344_s12, 1024  ;;  %p1757_p0 = scmp.lt.s32.totalorder %s344_s12, %s344_s12 }
  0x53   : > { %p1750_p11 = scmp.ne.s32.totalorder %s344_s12, %s1749_s29  ;;  %p1758_p1 = scmp.lt.s32.totalorder %s1749_s29, %s1749_s29 }
  0x55   : > { %p1752_p12 = pnand %p1750_p11, %p1985_p8  ;;  %p1759_p4 = por %p1758_p1, %p1757_p0 }
  0x57   : > { %p1753_p13 = pneg %p1752_p12 }
  0x59   : > { %p1760_p7 = pnand %p1759_p4, %p1753_p13 }
  0x5b   : > { %1763 = shalt.err (!%p1760_p7)
}
  0x5c   : > { %s1861_s18 = smov 64   ;;  %s1862_s22 = smov 4  }
  0x5d   : > { %1606 = dma.hbm_to_vmem [thread:$0]  (!%p1967_p5), %s2222_s7, 1024, %s344_s12, [#allocation8], %s1861_s18, %s1861_s18, %s1862_s22  }
  0x5e   : > { %s1863_s13 = smov [#allocation10]   ;;  %s1764_s30 = scalar_lea.hbm %s2224_s9, 2048 }
  0x5f   : > { %s359_s15 = sshll.u32 %s1863_s13, 4  ;;  %p1765_p2 = scmp.ne.s32.totalorder %s2224_s9, %s1764_s30  ;;  %s360_s15 = int_to_ptr.vmem [resolvable:$true] %s359_s15 }
  0x60   : > { %p1771_p9 = scmp.lt.u32.totalorder %s1764_s30, %s2224_s9 }
  0x61   : > { %p1767_p3 = pnand %p1765_p2, %p1985_p8 }
  0x63   : > { %p1768_p6 = pneg %p1767_p3 }
  0x65   : > { %p1773_p10 = pnand %p1771_p9, %p1768_p6 }
  0x67   : > { %1776 = shalt.err (!%p1773_p10)
}
  0x68   : > { %s1777_s12 = scalar_lea.vmem %s360_s15, 2048  ;;  %p1785_p0 = scmp.lt.s32.totalorder %s360_s15, %s360_s15 }
  0x69   : > { %p1778_p11 = scmp.ne.s32.totalorder %s360_s15, %s1777_s12  ;;  %p1786_p1 = scmp.lt.s32.totalorder %s1777_s12, %s1777_s12 }
  0x6b   : > { %p1780_p12 = pnand %p1778_p11, %p1985_p8  ;;  %p1787_p4 = por %p1786_p1, %p1785_p0 }
  0x6d   : > { %p1781_p13 = pneg %p1780_p12 }
  0x6f   : > { %p1788_p7 = pnand %p1787_p4, %p1781_p13 }
  0x71   : > { %1791 = shalt.err (!%p1788_p7)
}
  0x72   : > { %s1864_s18 = smov 128   ;;  %s1865_s22 = smov 8  }
  0x73   : > { %1609 = dma.hbm_to_vmem [thread:$0]  (!%p1967_p5), %s2224_s9, 2048, %s360_s15, [#allocation11], %s1864_s18, %s1864_s18, %s1865_s22  }
  0x74   : > { %p2243_p2 = scmp.ne.s32.totalorder %s2236_s24, 0 }
  0x75   : > { %p2244_p3 = scmp.ne.s32.totalorder (!%p2243_p2), %s2235_s23, 0 }
  0x76   : > { %378 = sbr.rel (%p2243_p2) target bundleno = 1541 (0x605), region = 64 }
  0x7d   : > { %1831 = dma.done.wait (%p2244_p3), [#allocation5], 64  }
  0x7e   : > { %1833 = vsyncadd (%p2244_p3), [#allocation5], 4294967232 }
  0x7f   : > { %1835 = dma.done.wait (%p2244_p3), [#allocation8], 1088  }
  0x80   : > { %1837 = vsyncadd (%p2244_p3), [#allocation8], 4294966208 }
  0x81   : > { %1839 = dma.done.wait (%p2244_p3), [#allocation11], 2048  }
  0x82   : > { %1841 = vsyncadd (%p2244_p3), [#allocation11], 4294965248  ;;  %p430_p5 = scmp.eq.s32.totalorder %s1848_s17, 0  ;;  %v2082_v0 = vld [vmem:[%s2215_s0] sm:$0xf] }
  0x83   : > { %v2087_v1 = vld [vmem:[%s2215_s0 + $0x4] sm:$0xf]  ;;  %v2092_v2 = vld [vmem:[%s2215_s0 + $0x8] sm:$0xf]  ;;  %v2097_v3 = vld [vmem:[%s2215_s0 + $0xc] sm:$0xf] }
  0x84   : > { %435 = sbr.rel (!%p430_p5) target bundleno = 139 (0x8b), region = 84  ;;  %v1866_v4 = vmov (%p430_p5), 0.0  }
  0x85   : > { %436 = vst [vmem:[#allocation3] sm:$0xff] (%p430_p5), %v1866_v4 }
  0x8b PF: > { %p1322_p8 = scmp.ne.s32.totalorder %s1848_s17, 0 }
  0x8c   : > { %v1660_v5 = vld [vmem:[%s2216_s1] sm:$0xff] (!%p1322_p8)   ;;  %v1323_v6 = vcombine.low (!%p1322_p8), %v2082_v0, %v2087_v1  ;;  %vm466_vm0 = vcmask (!%p1322_p8), 261120   ;;  %v1661_v7 = vld [vmem:[%s2216_s1 + $0x8] sm:$0xff] (!%p1322_p8)   ;;  %vm549_vm1 = vcmask (!%p1322_p8), 1043456   ;;  %v531_v8 = vld [vmem:[#allocation7] sm:$0xf] (!%p1322_p8)  ;;  %v1324_v14 = vcombine.low (!%p1322_p8), %v2092_v2, %v2097_v3 }
  0x8d   : > { %439 = sbr.rel (%p1322_p8) target bundleno = 589 (0x24d), region = 88  ;;  %1423 = vmatprep.subr.bf16.mxu0 (!%p1322_p8), %v1660_v5  ;;  %1575 = vmatprep.subr.msk.bf16.mxu1 (!%p1322_p8), %vm549_vm1, %v531_v8  ;;  %v551_v9 = vsel (!%p1322_p8), %vm549_vm1, %v531_v8, 0  ;;  %v1662_v10 = vld [vmem:[%s2216_s1] sm:$0xff] (!%p1322_p8)   ;;  %vm542_vm2 = vcmask (!%p1322_p8), 64512   ;;  %v530_v11 = vld [vmem:[#allocation4] sm:$0xf] (!%p1322_p8) }
  0x8e   : > { %1427 = vmatprep.mubr.msk.bf16.mxu0 (!%p1322_p8), %vm466_vm0, %v1323_v6  ;;  %1424 = vmatpush3.bf16.msra.mxu0 (!%p1322_p8), %v1660_v5  ;;  %v1663_v12 = vld [vmem:[%s2216_s1 + $0x8] sm:$0xff] (!%p1322_p8)   ;;  %v609_v13 = vsel (!%p1322_p8), %vm549_vm1, %v530_v11, 0  ;;  %v1335_v21 = vld [vmem:[%s2220_s5] ss:$0 sm:$0xff] (!%p1322_p8) }
  0x8f   : > { %1425 = vmatprep.subr.bf16.mxu0 (!%p1322_p8), %v1661_v7  ;;  %1432 = vmatpush3.bf16.msra.mxu1 (!%p1322_p8), %v551_v9 }
  0x90   : > { %1433 = vmatprep.mubr.msk.bf16.mxu1 (!%p1322_p8), %vm542_vm2, %v1662_v10  ;;  %1576 = vmatprep.subr.msk.bf16.mxu1 (!%p1322_p8), %vm549_vm1, %v530_v11 }
  0x92   : > { %1426 = vmatpush3.bf16.msra.mxu0 (!%p1322_p8), %v1661_v7  ;;  %1434 = vmatmul.mubr.msk.bf16.vlgmr.msra.gmra.mrb[0].mxu1 (!%p1322_p8), %vm542_vm2, %v1663_v12 }
  0x93   : > { %1438 = vmatpush3.bf16.msra.mxu1 (!%p1322_p8), %v609_v13 }
  0x95   : > { %1428 = vmatmul.mubr.msk.bf16.vlgmr.msra.gmra.mrb[0].mxu0 %vm466_vm0, %v1324_v14 }
 0x168   : > { %v1429_v15 = vpop.f32.mrb[0].mxu0 }
 0x169   : > { %v507_v16 = vpop.f32.mrb[1].mxu0 }
 0x16a   : > { %v1430_v17 = vpop.f32.mrb[2].mxu0 }
 0x16b   : > { %v529_v18 = vpack.c.bf16 %v1430_v17, %v1429_v15  ;;  %v510_v19 = vpop.f32.mrb[3].mxu0 }
 0x16c   : > { %v528_v20 = vpack.c.bf16 %v510_v19, %v507_v16 }
 0x16e   : > { %1439 = vmatprep.mubr.msk.bf16.mxu1 %vm542_vm2, %v528_v20 }
 0x16f   : > { %1440 = vmatmul.mubr.msk.bf16.vlgmr.msra.gmra.mrb[0].mxu1 %vm542_vm2, %v529_v18 }
 0x242   : > { %v1441_v22 = vpop.f32.mrb[0].mxu1 }
 0x243   : > { %v669_v23 = vadd.f32 %v1441_v22, %v1335_v21  ;;  %v645_v24 = vpop.f32.mrb[1].mxu1 }
 0x244   : > { %v667_v25 = vadd.f32 %v1335_v21, %v645_v24  ;;  %v1442_v26 = vpop.f32.mrb[2].mxu1 }
 0x245   : > { %v670_v27 = vadd.f32 %v1442_v26, %v1335_v21  ;;  %v648_v28 = vpop.f32.mrb[3].mxu1  ;;  %v673_v30 = vmax.f32 %v669_v23, 0.0 }
 0x246   : > { %v668_v29 = vadd.f32 %v1335_v21, %v648_v28  ;;  %v671_v32 = vmax.f32 %v667_v25, 0.0 }
 0x247   : > { %v674_v31 = vmax.f32 %v670_v27, 0.0 }
 0x248   : > { %v672_v33 = vmax.f32 %v668_v29, 0.0 }
 0x249   : > { %v676_v34 = vpack.c.bf16 %v674_v31, %v673_v30 }
 0x24a   : > { %v675_v35 = vpack.c.bf16 %v672_v33, %v671_v32 }
 0x24b   : > { %682 = vst [vmem:[#allocation2 + $0x8] sm:$0xff] %v676_v34 }
 0x24c   : > { %681 = vst [vmem:[#allocation2] sm:$0xff] %v675_v35 }
 0x24d PF: > { %p683_p6 = scmp.eq.s32.totalorder %s1848_s17, 1  ;;  %p1336_p9 = scmp.ne.s32.totalorder %s1848_s17, 1 }
 0x24e   : > { %v1337_v38 = vcombine.low (!%p1336_p9), %v2082_v0, %v2087_v1  ;;  %vm699_vm3 = vcmask (!%p1336_p9), 261120   ;;  %v1664_v39 = vld [vmem:[#allocation9] sm:$0xff] (!%p1336_p9)   ;;  %v1666_v41 = vld [vmem:[#allocation9 + $0x8] sm:$0xff] (!%p1336_p9)   ;;  %v1338_v42 = vcombine.low (!%p1336_p9), %v2092_v2, %v2097_v3  ;;  %v1668_v43 = vld [vmem:[#allocation9 + $0x10] sm:$0xff] (!%p1336_p9)   ;;  %v1867_v6 = vmov (!%p1336_p9), 0.0|0.0  }
 0x24f   : > { %686 = sbr.rel (%p1336_p9) target bundleno = 1267 (0x4f3), region = 92  ;;  %v1665_v40 = vld [vmem:[%s2221_s6] sm:$0xff] (!%p1336_p9)   ;;  %1451 = vmatprep.subr.bf16.mxu0 (!%p1336_p9), %v1664_v39  ;;  %v1667_v44 = vld [vmem:[%s2221_s6 + $0x8] sm:$0xff] (!%p1336_p9)   ;;  %v1670_v45 = vld [vmem:[#allocation9 + $0x18] sm:$0xff] (!%p1336_p9)   ;;  %vm1868_vm4 = vmmov (!%p1336_p9), 0   ;;  %v1869_v7 = vmov (!%p1336_p9), 0.0  }
 0x250   : > { %1447 = vmatprep.mubr.msk.bf16.mxu1 (!%p1336_p9), %vm699_vm3, %v1337_v38  ;;  %1452 = vmatpush3.bf16.msra.mxu0 (!%p1336_p9), %v1664_v39  ;;  %v1669_v46 = vld [vmem:[%s2221_s6 + $0x10] sm:$0xff] (!%p1336_p9)   ;;  %v1672_v47 = vld [vmem:[#allocation9 + $0x20] sm:$0xff] (!%p1336_p9)   ;;  %v1671_v48 = vld [vmem:[%s2221_s6 + $0x18] sm:$0xff] (!%p1336_p9)  }
 0x251   : > { %1453 = vmatprep.subr.bf16.mxu0 (!%p1336_p9), %v1666_v41  ;;  %v1674_v49 = vld [vmem:[#allocation9 + $0x28] sm:$0xff] (!%p1336_p9)   ;;  %v1673_v50 = vld [vmem:[%s2221_s6 + $0x20] sm:$0xff] (!%p1336_p9)   ;;  %v1676_v51 = vld [vmem:[#allocation9 + $0x30] sm:$0xff] (!%p1336_p9)  }
 0x252   : > { %v688_v37 = vld [vmem:[#allocation2 + $0x8] sm:$0xff] (!%p1336_p9)  ;;  %v1677_v53 = vld [vmem:[%s2221_s6 + $0x30] sm:$0xff] (!%p1336_p9)   ;;  %v1678_v54 = vld [vmem:[#allocation9 + $0x38] sm:$0xff] (!%p1336_p9)  }
 0x253   : > { %v687_v36 = vld [vmem:[#allocation2] sm:$0xff] (!%p1336_p9)  ;;  %v1675_v52 = vld [vmem:[%s2221_s6 + $0x28] sm:$0xff] (!%p1336_p9)   ;;  %v1679_v55 = vld [vmem:[%s2221_s6 + $0x38] sm:$0xff] (!%p1336_p9)  }
 0x254   : > { %1443 = vmatprep.subr.bf16.mxu1 (!%p1336_p9), %v687_v36  ;;  %1467 = vmatprep.mubr.bf16.mxu0 (!%p1336_p9), %v687_v36  ;;  %v1005_v56 = vld [vmem:[%s2217_s2] sm:$0xff] (!%p1336_p9)  ;;  %v1006_v57 = vld [vmem:[%s2217_s2 + $0x8] sm:$0xff] (!%p1336_p9)  ;;  %v1007_v58 = vld [vmem:[%s2217_s2 + $0x10] sm:$0xff] (!%p1336_p9) }
 0x255   : > { %1444 = vmatpush3.bf16.msra.mxu1 (!%p1336_p9), %v687_v36  ;;  %1454 = vmatpush3.bf16.msra.mxu0 (!%p1336_p9), %v1666_v41  ;;  %v1008_v59 = vld [vmem:[%s2217_s2 + $0x18] sm:$0xff] (!%p1336_p9)  ;;  %v1357_v9 = vld [vmem:[%s2223_s8] ss:$0 sm:$0xff] (!%p1336_p9)  ;;  %v1009_v28 = vld [vmem:[#allocation3] sm:$0xff] (!%p1336_p9) }
 0x256   : > { %1445 = vmatprep.subr.bf16.mxu1 %v688_v37  ;;  %1455 = vmatprep.subr.bf16.mxu0 %v1668_v43 }
 0x257   : > { %1010 = vxpose.xlu0.b32.start [1/4] (short) (narrow) %v1005_v56, 8 }
 0x259   : > { %1446 = vmatpush3.bf16.msra.mxu1 %v688_v37  ;;  %1456 = vmatpush3.bf16.msra.mxu0 %v1668_v43 }
 0x25a   : > { %1471 = vmatprep.subr.bf16.mxu1 %v1665_v40  ;;  %1457 = vmatprep.subr.bf16.mxu0 %v1670_v45 }
 0x25b   : > { %1011 = vxpose.xlu0.b32.cont [2/4] (short) (narrow) %v1006_v57, 8 }
 0x25c   : > { %1448 = vmatmul.mubr.msk.bf16.vlgmr.msra.gmra.mrb[0].mxu1 %vm699_vm3, %v1338_v42 }
 0x25d   : > { %1472 = vmatpush3.bf16.msra.mxu1 %v1665_v40  ;;  %1458 = vmatpush3.bf16.msra.mxu0 %v1670_v45 }
 0x25e   : > { %1473 = vmatprep.subr.bf16.mxu1 %v1667_v44  ;;  %1459 = vmatprep.subr.bf16.mxu0 %v1672_v47 }
 0x25f   : > { %1012 = vxpose.xlu0.b32.cont [3/4] (short) (narrow) %v1007_v58, 8 }
 0x261   : > { %1474 = vmatpush3.bf16.msra.mxu1 %v1667_v44  ;;  %1460 = vmatpush3.bf16.msra.mxu0 %v1672_v47 }
 0x262   : > { %1475 = vmatprep.subr.bf16.mxu1 %v1669_v46  ;;  %1461 = vmatprep.subr.bf16.mxu0 %v1674_v49 }
 0x263   : > { %1013 = vxpose.xlu0.b32.end [4/4] (short) (narrow) %v1008_v59, 8 }
 0x265   : > { %1476 = vmatpush3.bf16.msra.mxu1 %v1669_v46  ;;  %1462 = vmatpush3.bf16.msra.mxu0 %v1674_v49 }
 0x266   : > { %1477 = vmatprep.subr.bf16.mxu1 %v1671_v48  ;;  %1463 = vmatprep.subr.bf16.mxu0 %v1676_v51 }
 0x269   : > { %1478 = vmatpush3.bf16.msra.mxu1 %v1671_v48  ;;  %1464 = vmatpush3.bf16.msra.mxu0 %v1676_v51 }
 0x26a   : > { %1479 = vmatprep.subr.bf16.mxu1 %v1673_v50  ;;  %1465 = vmatprep.subr.bf16.mxu0 %v1678_v54 }
 0x26d   : > { %1480 = vmatpush3.bf16.msra.mxu1 %v1673_v50  ;;  %1466 = vmatpush3.bf16.msra.mxu0 %v1678_v54 }
 0x26e   : > { %1481 = vmatprep.subr.bf16.mxu1 %v1675_v52  ;;  %1537 = vmatprep.subr.bf16.mxu0 %v1867_v6 }
 0x270   : > { %1468 = vmatmul.mubr.bf16.vlgmr.msra.gmra.mrb[0].mxu0 %v688_v37 }
 0x271   : > { %1482 = vmatpush3.bf16.msra.mxu1 %v1675_v52  ;;  %1499 = vmatprep.mubr.msk.f32.mxu0 %vm1868_vm4, %v1869_v7 }
 0x272   : > { %1483 = vmatprep.subr.bf16.mxu1 %v1677_v53 }
 0x275   : > { %1484 = vmatpush3.bf16.msra.mxu1 %v1677_v53 }
 0x276   : > { %1485 = vmatprep.subr.bf16.mxu1 %v1679_v55 }
 0x279   : > { %1486 = vmatpush3.bf16.msra.mxu1 %v1679_v55 }
 0x2d7   : > { %v1026_v27 = vpop.trf.xlu0 }
 0x32f   : > { %v1449_v60 = vpop.f32.mrb[0].mxu1 }
 0x330   : > { %v740_v61 = vpop.f32.mrb[1].mxu1 }
 0x331   : > { %v1450_v62 = vpop.f32.mrb[2].mxu1 }
 0x332   : > { %v762_v63 = vpack.c.bf16 %v1450_v62, %v1449_v60  ;;  %v743_v0 = vpop.f32.mrb[3].mxu1 }
 0x333   : > { %v761_v1 = vpack.c.bf16 %v743_v0, %v740_v61 }
 0x335   : > { %1487 = vmatprep.mubr.bf16.mxu1 %v761_v1 }
 0x336   : > { %1488 = vmatmul.mubr.bf16.vlgmr.msra.gmra.mrb[4].mxu1 %v762_v63 }
 0x343   : > { %v1469_v2 = vpop.f32.mrb[0].mxu0 }
 0x344   : > { %v877_v3 = vpop.f32.mrb[1].mxu0 }
 0x345   : > { %v1470_v4 = vpop.f32.mrb[2].mxu0 }
 0x346   : > { %v880_v5 = vpop.f32.mrb[3].mxu0 }
 0x409   : > { %v1489_v8 = vpop.f32.mrb[4].mxu1 }
 0x40a   : > { %v983_v10 = vadd.f32 %v1489_v8, %v1469_v2  ;;  %v974_v11 = vpop.f32.mrb[5].mxu1 }
 0x40b   : > { %v975_v12 = vadd.f32 %v974_v11, %v877_v3  ;;  %v1490_v13 = vpop.f32.mrb[6].mxu1 }
 0x40c   : > { %v998_v14 = vadd.f32 %v1357_v9, %v983_v10  ;;  %v986_v15 = vadd.f32 %v1490_v13, %v1470_v4  ;;  %v977_v16 = vpop.f32.mrb[7].mxu1 }
 0x40d   : > { %v996_v17 = vadd.f32 %v1357_v9, %v975_v12  ;;  %v978_v18 = vadd.f32 %v977_v16, %v880_v5 }
 0x40e   : > { %v999_v19 = vadd.f32 %v1357_v9, %v986_v15  ;;  %v1002_v21 = vmax.f32 %v998_v14, 0.0 }
 0x40f   : > { %v997_v20 = vadd.f32 %v1357_v9, %v978_v18  ;;  %v1000_v23 = vmax.f32 %v996_v17, 0.0 }
 0x410   : > { %v1003_v22 = vmax.f32 %v999_v19, 0.0 }
 0x411   : > { %v1001_v24 = vmax.f32 %v997_v20, 0.0 }
 0x412   : > { %v1541_v25 = vpack.c.bf16 %v1003_v22, %v1002_v21 }
 0x413   : > { %v1538_v26 = vpack.c.bf16 %v1001_v24, %v1000_v23 }
 0x415   : > { %1539 = vmatpush3.bf16.msra.mxu0 %v1538_v26 }
 0x416   : > { %1540 = vmatprep.subr.bf16.mxu0 %v1867_v6 }
 0x419   : > { %1542 = vmatpush3.bf16.msra.mxu0 %v1541_v25 }
 0x41c   : > { %1500 = vmatmul.mubr.msk.f32.vlgmr.msra.gmra.mrb[4].mxu0 %vm699_vm3, %v1026_v27 }
 0x4ef   : > { %v1111_v29 = vpop.f32.mrb[4].mxu0 }
 0x4f0   : > { %v1115_v30 = vadd.f32 %v1111_v29, %v1009_v28  ;;  %v1501_v31 = vpop.f32.mrb[5].mxu0 }
 0x4f2   : > { %1116 = vst [vmem:[#allocation3] sm:$0xff] %v1115_v30 }
 0x4f3 PF: > { %1120 = sbr.rel (!%p683_p6) target bundleno = 1516 (0x5ec), region = 96  ;;  %v1122_v32 = vld [vmem:[#allocation10] sm:$0xff] (%p683_p6)  ;;  %v1123_v33 = vld [vmem:[#allocation10 + $0x8] sm:$0xff] (%p683_p6)  ;;  %v1124_v34 = vld [vmem:[#allocation10 + $0x10] sm:$0xff] (%p683_p6)  ;;  %v1870_v35 = vmov (%p683_p6), 0.0|0.0   ;;  %vm1871_vm5 = vmmov (%p683_p6), 0  }
 0x4f4   : > { %1543 = vmatprep.subr.bf16.mxu0 (%p683_p6), %v1870_v35  ;;  %v1544_v36 = vpack.c.bf16 (%p683_p6), %v1123_v33, %v1122_v32  ;;  %v1125_v37 = vld [vmem:[#allocation10 + $0x18] sm:$0xff] (%p683_p6)  ;;  %v1872_v38 = vmov (%p683_p6), 0.0   ;;  %v1126_v40 = vld [vmem:[#allocation10 + $0x20] sm:$0xff] (%p683_p6)  ;;  %v1127_v41 = vld [vmem:[#allocation10 + $0x28] sm:$0xff] (%p683_p6) }
 0x4f5   : > { %1534 = vmatprep.mubr.msk.f32.mxu0 (%p683_p6), %vm1871_vm5, %v1872_v38  ;;  %v1547_v39 = vpack.c.bf16 (%p683_p6), %v1125_v37, %v1124_v34  ;;  %v1550_v42 = vpack.c.bf16 (%p683_p6), %v1127_v41, %v1126_v40  ;;  %v1128_v43 = vld [vmem:[#allocation10 + $0x30] sm:$0xff] (%p683_p6)  ;;  %v1129_v44 = vld [vmem:[#allocation10 + $0x38] sm:$0xff] (%p683_p6)  ;;  %v1130_v46 = vld [vmem:[#allocation10 + $0x40] sm:$0xff] (%p683_p6) }
 0x4f6   : > { %1545 = vmatpush3.bf16.msra.mxu0 (%p683_p6), %v1544_v36  ;;  %v1553_v45 = vpack.c.bf16 (%p683_p6), %v1129_v44, %v1128_v43  ;;  %v1131_v47 = vld [vmem:[#allocation10 + $0x48] sm:$0xff] (%p683_p6)  ;;  %v1132_v49 = vld [vmem:[#allocation10 + $0x50] sm:$0xff] (%p683_p6)  ;;  %v1133_v50 = vld [vmem:[#allocation10 + $0x58] sm:$0xff] (%p683_p6) }
 0x4f7   : > { %1546 = vmatprep.subr.bf16.mxu0 (%p683_p6), %v1870_v35  ;;  %v1556_v48 = vpack.c.bf16 (%p683_p6), %v1131_v47, %v1130_v46  ;;  %v1559_v51 = vpack.c.bf16 (%p683_p6), %v1133_v50, %v1132_v49  ;;  %v1134_v52 = vld [vmem:[#allocation10 + $0x60] sm:$0xff] (%p683_p6)  ;;  %v1135_v53 = vld [vmem:[#allocation10 + $0x68] sm:$0xff] (%p683_p6)  ;;  %v1136_v55 = vld [vmem:[#allocation10 + $0x70] sm:$0xff] (%p683_p6) }
 0x4f8   : > { %v1562_v54 = vpack.c.bf16 (%p683_p6), %v1135_v53, %v1134_v52  ;;  %v1137_v56 = vld [vmem:[#allocation10 + $0x78] sm:$0xff] (%p683_p6)  ;;  %v1360_v59 = vld [vmem:[%s2225_s10] ss:$0 sm:$0xff] (%p683_p6) }
 0x4f9   : > { %v1565_v57 = vpack.c.bf16 (%p683_p6), %v1137_v56, %v1136_v55  ;;  %v1121_v58 = vld [vmem:[#allocation3] sm:$0xff] (%p683_p6) }
 0x4fa   : > { %1548 = vmatpush3.bf16.msra.mxu0 %v1547_v39 }
 0x4fb   : > { %1549 = vmatprep.subr.bf16.mxu0 %v1870_v35 }
 0x4fe   : > { %1551 = vmatpush3.bf16.msra.mxu0 %v1550_v42 }
 0x4ff   : > { %1552 = vmatprep.subr.bf16.mxu0 %v1870_v35 }
 0x502   : > { %1554 = vmatpush3.bf16.msra.mxu0 %v1553_v45 }
 0x503   : > { %1555 = vmatprep.subr.bf16.mxu0 %v1870_v35 }
 0x506   : > { %1557 = vmatpush3.bf16.msra.mxu0 %v1556_v48 }
 0x507   : > { %1558 = vmatprep.subr.bf16.mxu0 %v1870_v35 }
 0x50a   : > { %1560 = vmatpush3.bf16.msra.mxu0 %v1559_v51 }
 0x50b   : > { %1561 = vmatprep.subr.bf16.mxu0 %v1870_v35 }
 0x50e   : > { %1563 = vmatpush3.bf16.msra.mxu0 %v1562_v54 }
 0x50f   : > { %1564 = vmatprep.subr.bf16.mxu0 %v1870_v35 }
 0x512   : > { %1566 = vmatpush3.bf16.msra.mxu0 %v1565_v57 }
 0x515   : > { %1535 = vmatmul.mubr.f32.vlgmr.msra.gmra.mrb[0].mxu0 %v1121_v58 }
 0x5e8   : > { %v1211_v60 = vpop.f32.mrb[0].mxu0 }
 0x5e9   : > { %v1212_v61 = vadd.f32 %v1360_v59, %v1211_v60  ;;  %v1536_v62 = vpop.f32.mrb[1].mxu0 }
 0x5eb   : > { %1215 = vst [vmem:[#allocation12] sm:$0xff] %v1212_v61 }
 0x5ec PF: > { %s2245_s28 = sadd.s32 4294967295, %s1856_s19   ;;  %s1873_s21 = smov [#allocation12]  }
 0x5ed   : > { %p2180_p10 = scmp.eq.s32.totalorder %s2245_s28, 1  ;;  %s1223_s29 = sshll.u32 %s1873_s21, 4  ;;  %s1224_s29 = int_to_ptr.vmem [resolvable:$true] %s1223_s29 }
 0x5ee   : > { %s1792_s12 = scalar_lea.vmem %s1224_s29, 128  ;;  %p1799_p0 = scmp.lt.s32.totalorder %s1224_s29, %s1224_s29 }
 0x5ef   : > { %p1793_p11 = scmp.ne.s32.totalorder %s1224_s29, %s1792_s12  ;;  %p1800_p1 = scmp.lt.s32.totalorder %s1792_s12, %s1792_s12 }
 0x5f1   : > { %p1794_p12 = pnand %p1793_p11, %p2180_p10  ;;  %p1801_p4 = por %p1800_p1, %p1799_p0 }
 0x5f3   : > { %p1795_p13 = pneg %p1794_p12 }
 0x5f5   : > { %p1802_p7 = pnand %p1801_p4, %p1795_p13 }
 0x5f7   : > { %1805 = shalt.err (!%p1802_p7)
}
 0x5f8   : > { %s1806_s27 = scalar_lea.hbm %s2226_s11, 128 }
 0x5f9   : > { %p1807_p2 = scmp.ne.s32.totalorder %s2226_s11, %s1806_s27  ;;  %p1812_p8 = scmp.lt.u32.totalorder %s1806_s27, %s2226_s11 }
 0x5fb   : > { %p1808_p3 = pnand %p1807_p2, %p2180_p10 }
 0x5fd   : > { %p1809_p5 = pneg %p1808_p3 }
 0x5ff   : > { %p1814_p6 = pnand %p1812_p8, %p1809_p5 }
 0x601   : > { %1817 = shalt.err (!%p1814_p6)
}
 0x602   : > { %1594 = dma.vmem_to_hbm [thread:$0]  (%p2180_p10), %s1224_s29, 128, %s2226_s11, [#allocation6]  }
 0x603   : > { %1843 = dma.done.wait (%p2180_p10), [#allocation6], 128  }
 0x604   : > { %1845 = vsyncadd (%p2180_p10), [#allocation6], 4294967168 }
 0x605 PF: > { %s25_s19 = sadd.s32 1, %s1856_s19   ;;  %s2247_s17 = sld [smem:[#allocation17_spill]] }
 0x606   : > { %p22_p9 = scmp.ge.s32.totalorder %s25_s19, 4   ;;  %s2248_s18 = smov %s2250_s25 }
 0x608   :  { %24 = sbr.rel (!%p22_p9) target bundleno = 8 (0x8), region = 126 }
 0x60f   :  { %1236 = vsyncpa [#allocation5], 1 }
 0x610   :  { %1238 = vsyncpa [#allocation5 + $0x1], 1 }
 0x611   :  { %1239 = vsyncpa [#allocation8], 1 }
 0x612   :  { %1240 = vsyncpa [#allocation11], 1 }
 0x613   :  { %1241 = vsyncpa [#allocation6], 1 }
 0x614   :  { %1243 = vsyncpa [#allocation6 + $0x1], 1 }

</bundles_post_ra>
